<compile_context>
chip_gen: v6e
topology: v6e:2x2x1
jax: 0.10.0
libtpu: 0.0.40
codegen_flags: <defaults>
</compile_context>

<pallas_src>
import jax
import jax.numpy as jnp
from jax.experimental import pallas as pl
from jax.experimental.pallas import tpu as pltpu


def _round_up(n, m):
    return pl.cdiv(n, m) * m


def projection_head_kernel(x2_ref, w1_ref, b1_ref, w2_ref, b2_ref, o_ref):
    # x2_ref: (tb2, 2*in_dim) — two logical batch rows per physical (lane-dense) row.
    # Block-diagonal weights compute both halves with a single MXU pass per layer.
    h = jnp.dot(x2_ref[...], w1_ref[...], preferred_element_type=jnp.float32)
    h = jnp.maximum(h + b1_ref[...], 0.0)                 # bias + ReLU in f32 on the VPU
    y = jnp.dot(h.astype(w2_ref.dtype), w2_ref[...],
                preferred_element_type=jnp.float32) + b2_ref[...]
    o_ref[...] = y.astype(o_ref.dtype)                    # full 128-lane store


def projection_head(x, w1, b1, w2, b2, *, tile_b=None,
                    compute_dtype=jnp.bfloat16, out_dtype=None):
    """x: (B, in_dim); w1: (in_dim, hidden); b1: (hidden,) or (1, hidden);
    w2: (hidden, out_dim); b2: (out_dim,) or (1, out_dim). Returns (B, out_dim)."""
    B, in_dim = x.shape
    hidden = w1.shape[1]
    out_dim = w2.shape[1]
    if out_dtype is None:
        out_dtype = compute_dtype

    # Lane-density requirements for the paired/block-diagonal layout.
    assert (2 * in_dim) % 128 == 0 and (2 * hidden) % 128 == 0 and (2 * out_dim) % 128 == 0, (
        "projection_head kernel requires in_dim/hidden/out_dim to be multiples of 64")

    # ---- packed (block-diagonal) params, built once; < 200 KB total --------------
    def _blkdiag2(w):
        z = jnp.zeros_like(w)
        top = jnp.concatenate([w, z], axis=1)
        bot = jnp.concatenate([z, w], axis=1)
        return jnp.concatenate([top, bot], axis=0).astype(compute_dtype)

    w1_blk = _blkdiag2(w1)                                        # (2*in_dim, 2*hidden)
    w2_blk = _blkdiag2(w2)                                        # (2*hidden, 2*out_dim)
    b1_blk = jnp.concatenate([b1.reshape(1, hidden)] * 2, axis=1).astype(jnp.float32)
    b2_blk = jnp.concatenate([b2.reshape(1, out_dim)] * 2, axis=1).astype(jnp.float32)

    # Cast activations at the boundary (fuses with the producer under jit); ideally the
    # caller already provides bf16.
    x = x.astype(compute_dtype)

    # ---- pair rows: (B,in_dim) -> (B/2, 2*in_dim), free row-major reinterpretation --
    B_even = B + (B % 2)
    if B_even != B:
        # Only odd B pays a pad copy; ragged tiles below need no padding at all.
        x = jnp.concatenate([x, jnp.zeros((1, in_dim), x.dtype)], axis=0)
    B_half = B_even // 2
    x2 = x.reshape(B_half, 2 * in_dim)

    # ---- tile selection -----------------------------------------------------------
    if tile_b is None:
        tile_b = 8192 if jnp.dtype(compute_dtype).itemsize <= 2 else 4096
    # Aim for >= ~4 grid steps when the batch allows (both v7x TCs get >=2 tiles and
    # keep pipelining); never below 32 rows so tb2 is a multiple of 16 (bf16 (16,128)
    # sublane packing).
    tile_b = min(int(tile_b), max(32, _round_up(pl.cdiv(B_even, 4), 32)))
    tile_b = max(32, _round_up(tile_b, 32))
    tb2 = tile_b // 2
    grid = (pl.cdiv(B_half, tb2),)   # ragged last tile: Pallas clips its write-back

    x_bytes = jnp.dtype(compute_dtype).itemsize
    o_bytes = jnp.dtype(out_dtype).itemsize

    # Explicit VMEM budget: double-buffered x + out tiles, resident packed weights,
    # plus headroom. Floor 32 MiB, cap 48 MiB (v7x has 64 MiB VMEM per TensorCore).
    tile_bytes = tb2 * (2 * in_dim) * x_bytes + tb2 * (2 * out_dim) * o_bytes
    weight_bytes = (w1_blk.size + w2_blk.size) * x_bytes + (b1_blk.size + b2_blk.size) * 4
    needed = 2 * tile_bytes + weight_bytes
    vmem_limit = int(min(48 << 20, max(32 << 20, 2 * needed)))

    cost = pl.CostEstimate(
        flops=2 * B_half * ((2 * in_dim) * (2 * hidden) + (2 * hidden) * (2 * out_dim)),
        transcendentals=0,
        bytes_accessed=B_half * (2 * in_dim) * x_bytes
        + B_half * (2 * out_dim) * o_bytes
        + weight_bytes,
    )

    out2 = pl.pallas_call(
        projection_head_kernel,
        out_shape=jax.ShapeDtypeStruct((B_half, 2 * out_dim), out_dtype),
        grid_spec=pltpu.PrefetchScalarGridSpec(
            num_scalar_prefetch=0,
            grid=grid,
            in_specs=[
                pl.BlockSpec((tb2, 2 * in_dim), lambda i: (i, 0)),       # pipelined x tiles
                pl.BlockSpec((2 * in_dim, 2 * hidden), lambda i: (0, 0)),  # resident weights
                pl.BlockSpec((1, 2 * hidden), lambda i: (0, 0)),
                pl.BlockSpec((2 * hidden, 2 * out_dim), lambda i: (0, 0)),
                pl.BlockSpec((1, 2 * out_dim), lambda i: (0, 0)),
            ],
            out_specs=pl.BlockSpec((tb2, 2 * out_dim), lambda i: (i, 0)),
        ),
        compiler_params=pltpu.CompilerParams(
            dimension_semantics=("parallel",),   # batch tiles split across v7x's two TCs
            vmem_limit_bytes=vmem_limit,
        ),
        cost_estimate=cost,
    )(x2, w1_blk, b1_blk, w2_blk, b2_blk)

    out = out2.reshape(B_even, out_dim)          # free row-major reinterpretation
    return out[:B] if B_even != B else out


def init_params(key, in_dim=128, hidden_dim=64, out_dim=64, dtype=jnp.float32):
    """Deterministic init mimicking PyTorch nn.Linear default (uniform +-1/sqrt(fan_in)).
    Weights are stored as (in_features, out_features) = W.T relative to PyTorch."""
    k1, k2, k3, k4 = jax.random.split(key, 4)
    bound1 = 1.0 / (in_dim ** 0.5)
    bound2 = 1.0 / (hidden_dim ** 0.5)
    w1 = jax.random.uniform(k1, (in_dim, hidden_dim), dtype, -bound1, bound1)
    b1 = jax.random.uniform(k2, (1, hidden_dim), dtype, -bound1, bound1)
    w2 = jax.random.uniform(k3, (hidden_dim, out_dim), dtype, -bound2, bound2)
    b2 = jax.random.uniform(k4, (1, out_dim), dtype, -bound2, bound2)
    return w1, b1, w2, b2


if __name__ == "__main__":
    key = jax.random.PRNGKey(0)
    kx, kp = jax.random.split(key)

    # Small demo shapes; odd B + tiny tile exercise the ragged-last-tile path.
    B, in_dim, hidden_dim, out_dim = 37, 128, 64, 64
    x = jax.random.normal(kx, (B, in_dim), jnp.float32)
    w1, b1, w2, b2 = init_params(kp, in_dim, hidden_dim, out_dim)

    # Reference in plain JAX (matches the PyTorch forward).
    ref = jnp.maximum(x @ w1 + b1, 0.0) @ w2 + b2

    # Default bandwidth-optimized bf16 path; tile_b=32 -> multi-step ragged grid.
    out_bf16 = jax.block_until_ready(projection_head(x, w1, b1, w2, b2, tile_b=32))
    # f32 path (PyTorch-matching numerics), auto tile selection.
    out_f32 = jax.block_until_ready(
        projection_head(x, w1, b1, w2, b2,
                        compute_dtype=jnp.float32, out_dtype=jnp.float32))

    assert out_bf16.shape == (B, out_dim) and out_bf16.dtype == jnp.bfloat16
    assert out_f32.shape == (B, out_dim) and out_f32.dtype == jnp.float32
    assert jnp.allclose(out_f32, ref, atol=1e-4, rtol=1e-4)
    assert jnp.allclose(out_bf16.astype(jnp.float32), ref, atol=5e-2, rtol=5e-2)

    print("KERNEL_OK")
</pallas_src>

<mosaic_0001>
module attributes {stable_mosaic.version = 11 : i64} {
  func.func @projection_head_kernel(%arg0: i32, %arg1: memref<16x256xbf16, #tpu.memory_space<vmem>>, %arg2: memref<256x128xbf16, #tpu.memory_space<vmem>>, %arg3: memref<1x128xf32, #tpu.memory_space<vmem>>, %arg4: memref<128x128xbf16, #tpu.memory_space<vmem>>, %arg5: memref<1x128xf32, #tpu.memory_space<vmem>>, %arg6: memref<16x128xbf16, #tpu.memory_space<vmem>>) attributes {dimension_semantics = [#tpu.dimension_semantics<parallel>], iteration_bounds = array<i64: 2>, scalar_prefetch = 0 : i64, scratch_operands = 0 : i64, tpu.core_type = #tpu.core_type<tc>, window_params = [{transform_indices = @transform_0, window_bounds = array<i64: 16, 256>}, {pipeline_mode = #tpu.pipeline_mode<synchronous>, transform_indices = @transform_1, window_bounds = array<i64: 256, 128>}, {pipeline_mode = #tpu.pipeline_mode<synchronous>, transform_indices = @transform_2, window_bounds = array<i64: 1, 128>}, {pipeline_mode = #tpu.pipeline_mode<synchronous>, transform_indices = @transform_3, window_bounds = array<i64: 128, 128>}, {pipeline_mode = #tpu.pipeline_mode<synchronous>, transform_indices = @transform_4, window_bounds = array<i64: 1, 128>}, {transform_indices = @transform_5, window_bounds = array<i64: 16, 128>}]} {
    %c0 = arith.constant 0 : index
    %c0_0 = arith.constant 0 : index
    %0 = vector.load %arg1[%c0, %c0_0] : memref<16x256xbf16, #tpu.memory_space<vmem>>, vector<16x256xbf16>
    %c0_1 = arith.constant 0 : index
    %c0_2 = arith.constant 0 : index
    %1 = vector.load %arg2[%c0_1, %c0_2] : memref<256x128xbf16, #tpu.memory_space<vmem>>, vector<256x128xbf16>
    %cst = arith.constant dense<0.000000e+00> : vector<16x128xf32>
    %2 = tpu.matmul %0, %1, %cst {dimension_numbers = #tpu.dot_dimension_numbers<[1], [0], [0], [1], [0, 0, 1, 1], [], []>} : vector<16x256xbf16>, vector<256x128xbf16>, vector<16x128xf32> -> vector<16x128xf32>
    %c0_3 = arith.constant 0 : index
    %c0_4 = arith.constant 0 : index
    %3 = vector.load %arg3[%c0_3, %c0_4] : memref<1x128xf32, #tpu.memory_space<vmem>>, vector<1x128xf32>
    %4 = vector.broadcast %3 : vector<1x128xf32> to vector<16x128xf32>
    %5 = arith.addf %2, %4 : vector<16x128xf32>
    %cst_5 = arith.constant 0.000000e+00 : f32
    %6 = vector.broadcast %cst_5 : f32 to vector<16x128xf32>
    %7 = arith.maximumf %5, %6 : vector<16x128xf32>
    %8 = arith.truncf %7 : vector<16x128xf32> to vector<16x128xbf16>
    %c0_6 = arith.constant 0 : index
    %c0_7 = arith.constant 0 : index
    %9 = vector.load %arg4[%c0_6, %c0_7] : memref<128x128xbf16, #tpu.memory_space<vmem>>, vector<128x128xbf16>
    %cst_8 = arith.constant dense<0.000000e+00> : vector<16x128xf32>
    %10 = tpu.matmul %8, %9, %cst_8 {dimension_numbers = #tpu.dot_dimension_numbers<[1], [0], [0], [1], [0, 0, 1, 1], [], []>} : vector<16x128xbf16>, vector<128x128xbf16>, vector<16x128xf32> -> vector<16x128xf32>
    %c0_9 = arith.constant 0 : index
    %c0_10 = arith.constant 0 : index
    %11 = vector.load %arg5[%c0_9, %c0_10] : memref<1x128xf32, #tpu.memory_space<vmem>>, vector<1x128xf32>
    %12 = vector.broadcast %11 : vector<1x128xf32> to vector<16x128xf32>
    %13 = arith.addf %10, %12 : vector<16x128xf32>
    %14 = arith.truncf %13 : vector<16x128xf32> to vector<16x128xbf16>
    %c0_11 = arith.constant 0 : index
    %c0_12 = arith.constant 0 : index
    %15 = vector.load %arg6[%c0_11, %c0_12] : memref<16x128xbf16, #tpu.memory_space<vmem>>, vector<16x128xbf16>
    tpu.vector_store %arg6[%c0_11, %c0_12], %14 {strides = array<i32>} : memref<16x128xbf16, #tpu.memory_space<vmem>>, vector<16x128xbf16>,
    return
  }
  func.func @transform_0(%arg0: i32) -> (i32, i32) {
    %c0_i32 = arith.constant 0 : i32
    %c0_i32_0 = arith.constant 0 : i32
    return %arg0, %c0_i32 : i32, i32
  }
  func.func @transform_1(%arg0: i32) -> (i32, i32) {
    %c0_i32 = arith.constant 0 : i32
    %c0_i32_0 = arith.constant 0 : i32
    %c0_i32_1 = arith.constant 0 : i32
    return %c0_i32, %c0_i32_0 : i32, i32
  }
  func.func @transform_2(%arg0: i32) -> (i32, i32) {
    %c0_i32 = arith.constant 0 : i32
    %c0_i32_0 = arith.constant 0 : i32
    %c0_i32_1 = arith.constant 0 : i32
    return %c0_i32, %c0_i32_0 : i32, i32
  }
  func.func @transform_3(%arg0: i32) -> (i32, i32) {
    %c0_i32 = arith.constant 0 : i32
    %c0_i32_0 = arith.constant 0 : i32
    %c0_i32_1 = arith.constant 0 : i32
    return %c0_i32, %c0_i32_0 : i32, i32
  }
  func.func @transform_4(%arg0: i32) -> (i32, i32) {
    %c0_i32 = arith.constant 0 : i32
    %c0_i32_0 = arith.constant 0 : i32
    %c0_i32_1 = arith.constant 0 : i32
    return %c0_i32, %c0_i32_0 : i32, i32
  }
  func.func @transform_5(%arg0: i32) -> (i32, i32) {
    %c0_i32 = arith.constant 0 : i32
    %c0_i32_0 = arith.constant 0 : i32
    return %arg0, %c0_i32 : i32, i32
  }
}

</mosaic_0001>

<bundles_post_ra>
// kernel: tpu_custom_call.1
= control target key start
LH: loop header
LB: loop body
LE: loop exit
PB: predicated region body
PF: predicated region fallthrough
CT: control target
= control target key end

     0   :  { %10 = vsyncpa [#allocation3], 0  ;;  %s1345_s0 = inlined_call_operand.hbm [shape: bf16[19,256], index: 0, kind: input, shape index: {}]   ;;  %s1346_s1 = inlined_call_operand.hbm [shape: bf16[256,128], index: 1, kind: input, shape index: {}]   ;;  %s1347_s2 = inlined_call_operand.vmem [shape: f32[1,128], index: 2, kind: input, shape index: {}]   ;;  %s1348_s3 = inlined_call_operand.hbm [shape: bf16[128,128], index: 3, kind: input, shape index: {}]   ;;  %s1349_s4 = inlined_call_operand.vmem [shape: f32[1,128], index: 4, kind: input, shape index: {}]   ;;  %s1350_s5 = inlined_call_operand.hbm [shape: bf16[19,128], index: 5, kind: output, shape index: {}]  }
   0x1   :  { %12 = vsyncpa [#allocation3 + $0x1], 0 }
   0x2   :  { %13 = vsyncpa [#allocation6], 0 }
   0x3   :  { %14 = vsyncpa [#allocation4], 0 }
   0x4   :  { %16 = vsyncpa [#allocation4 + $0x1], 0  ;;  %s1122_s18 = smov 0   ;;  %s1124_s19 = smov 0  }
   0x5   :  { %s1126_s20 = smov 0   ;;  %s1128_s21 = smov 0  }
   0x6 LB: > { %s1143_s22 = sadd.s32 4294967295, %s1078_s21   ;;  %s717_s23 = sadd.s32 4294967294, %s1078_s21   ;;  %s1078_s21 = sphi %s1128_s21, %s1367_s21   ;;  %s1074_s20 = sphi %s1126_s20, %s1366_s20   ;;  %s1070_s19 = sphi %s1124_s19, %s1365_s19   ;;  %s1066_s18 = sphi %s1122_s18, %s1364_s18  }
   0x7   : > { %s1147_s24 = sadd.s32 1, %s1078_s21   ;;  %s29_s25 = sadd.s32 1, %s1074_s20 }
   0x8   : > { %s26_s26 = ssub.s32 %s1078_s21, %s1147_s24  ;;  %p36_p0 = scmp.ne.s32.totalorder %s1074_s20, %s1070_s19 }
   0x9   : > { %p27_p1 = scmp.eq.s32.totalorder %s26_s26, 0  ;;  %p37_p2 = scmp.eq.s32.totalorder %s1078_s21, 0 }
   0xa   : > { %p42_p3 = scmp.ne.s32.totalorder %s1070_s19, %s1066_s18  ;;  %p1351_p4 = scmp.eq.s32.totalorder %s1143_s22, 0 }
   0xb   : > { %s1159_s27 = scalar_select %p27_p1, %s1074_s20, %s29_s25  }
   0xc   : > { %p1161_p5 = por %p37_p2, %p36_p0  ;;  %p1167_p6 = por %p1351_p4, %p42_p3 }
   0xd   : > { %p150_p7 = scmp.eq.s32.totalorder %s1143_s22, 1  ;;  %p156_p8 = scmp.eq.s32.totalorder %s717_s23, 1 }
   0xe   : > { %s1354_s29 = scalar_select %p1167_p6, 1, 0 }
   0xf   : > { %p718_p9 = scmp.ge.s32.totalorder %s1078_s21, 1  ;;  %p163_p10 = scmp.lt.s32.totalorder %s1078_s21, 3 }
  0x10   : > { %p1174_p11 = por %p150_p7, %p36_p0  ;;  %p1178_p12 = por %p156_p8, %p42_p3 }
  0x11   : > { %p1182_p13 = pnand %p718_p9, %p163_p10  ;;  %s1080_s8 = smov [#allocation5]  }
  0x12   : > { %s1355_s30 = scalar_select %p1174_p11, 1, 0 }
  0x13   : > { %s1356_s6 = scalar_select %p1178_p12, 1, 0 }
  0x14   : > { %p847_p1 = pneg %p1182_p13  ;;  %s175_s9 = sshll.u32 %s1080_s8, 4  ;;  %s176_s9 = int_to_ptr.vmem [resolvable:$true] %s175_s9 }
  0x15   : > { %s1081_s11 = smov [#allocation7]   ;;  %s943_s13 = scalar_lea.vmem %s176_s9, 2048 }
  0x16   : > { %p1190_p2 = pnand %p847_p1, %p1351_p4  ;;  %s191_s12 = sshll.u32 %s1081_s11, 4  ;;  %s192_s12 = int_to_ptr.vmem [resolvable:$true] %s191_s12 }
  0x17   : > { %p944_p3 = scmp.ne.s32.totalorder %s176_s9, %s943_s13  ;;  %p951_p9 = scmp.lt.s32.totalorder %s176_s9, %s176_s9 }
  0x18   : > { %p934_p0 = pneg %p1190_p2  ;;  %p952_p10 = scmp.lt.s32.totalorder %s943_s13, %s943_s13 }
  0x1a   : > { %p946_p7 = pnand %p944_p3, %p934_p0  ;;  %p953_p12 = por %p952_p10, %p951_p9 }
  0x1c   : > { %p947_p8 = pneg %p946_p7 }
  0x1e   : > { %p954_p1 = pnand %p953_p12, %p947_p8 }
  0x20   : > { %957 = shalt.err (!%p954_p1)
}
  0x21   : > { %s1082_s14 = smov 64   ;;  %s1083_s15 = smov 4  }
  0x22   : > { %850 = dma.hbm_to_vmem [thread:$0]  (!%p1190_p2), %s1346_s1, 2048, %s176_s9, [#allocation6], %s1082_s14, %s1082_s14, %s1083_s15  }
  0x23   : > { %s969_s23 = scalar_lea.vmem %s192_s12, 1024  ;;  %p977_p11 = scmp.lt.s32.totalorder %s192_s12, %s192_s12 }
  0x24   : > { %p970_p4 = scmp.ne.s32.totalorder %s192_s12, %s969_s23  ;;  %p978_p6 = scmp.lt.s32.totalorder %s969_s23, %s969_s23 }
  0x26   : > { %p972_p3 = pnand %p970_p4, %p934_p0  ;;  %p979_p9 = por %p978_p6, %p977_p11 }
  0x28   : > { %p973_p7 = pneg %p972_p3 }
  0x2a   : > { %p980_p12 = pnand %p979_p9, %p973_p7 }
  0x2c   : > { %983 = shalt.err (!%p980_p12)
}
  0x2d   : > { %853 = dma.hbm_to_vmem [thread:$0]  (!%p1190_p2), %s1348_s3, 1024, %s192_s12, [#allocation6], %s1082_s14, %s1082_s14, %s1083_s15  }
  0x2e   : > { %p721_p8 = scmp.ge.s32.totalorder %s1078_s21, 2 }
  0x30   : > { %204 = sbr.rel (%p721_p8) target bundleno = 85 (0x55), region = 32 }
  0x35   : > { %207 = sbr.rel (!%p1161_p5) target bundleno = 85 (0x55), region = 36  ;;  %s208_s8 = sand.u32 (%p1161_p5), 1, %s1074_s20  }
  0x36   : > { %s723_s9 = sshll.u32 (%p1161_p5), %s1078_s21, 1  ;;  %s722_s11 = sshll.u32 (%p1161_p5), %s208_s8, 4 }
  0x37   : > { %s214_s13 = ssub.s32 (%p1161_p5), 3, %s723_s9  ;;  %s1222_s14 = scalar_lea.sflag (%p1161_p5), [#allocation3], %s208_s8 }
  0x38   : > { %p215_p4 = scmp.lt.s32.totalorder (%p1161_p5), %s214_s13, 2  ;;  %s212_s15 = scalar_lea.vmem (%p1161_p5), [#allocation2], %s722_s11 }
  0x3a   : > { %s1369_s13 = smov (!%p215_p4, %s214_s13), 2 }
  0x3b   : > { %s1219_s10 = sshll.u32 %s1369_s13, 7 }
  0x3c   : > { %s220_s12 = ssub.s32 256, %s1219_s10 }
  0x3d   : > { %221 = vsyncadd %s1222_s14, %s220_s12  ;;  %p726_p5 = scmp.ne.s32.totalorder %s1219_s10, 0  ;;  %s777_s28 = sshll.u32 %s1078_s21, 8 }
  0x3e   : > { %s1230_s23 = scalar_lea.hbm %s1345_s0, %s777_s28  ;;  %s227_s25 = sshll.u32 %s212_s15, 4  ;;  %s1232_s25 = int_to_ptr.vmem [resolvable:$true] %s227_s25 }
  0x3f   : > { %s984_s26 = scalar_lea.hbm %s1230_s23, %s1219_s10  ;;  %s988_s11 = scalar_lea.hbm %s1345_s0, 384 }
  0x40   : > { %p985_p6 = scmp.ne.s32.totalorder %s1230_s23, %s984_s26  ;;  %p989_p0 = scmp.lt.s32.totalorder %s1230_s23, %s1345_s0 }
  0x41   : > { %p990_p10 = scmp.lt.s32.totalorder %s988_s11, %s984_s26 }
  0x42   : > { %p986_p11 = pnand %p985_p6, %p726_p5 }
  0x43   : > { %p991_p1 = por %p990_p10, %p989_p0 }
  0x44   : > { %p987_p2 = pneg %p986_p11 }
  0x46   : > { %p992_p3 = pnand %p991_p1, %p987_p2 }
  0x48   : > { %995 = shalt.err (!%p992_p3)
}
  0x49   : > { %s996_s15 = scalar_lea.vmem %s1232_s25, %s1219_s10  ;;  %s1084_s28 = smov [#allocation2]  }
  0x4a   : > { %p997_p7 = scmp.ne.s32.totalorder %s1232_s25, %s996_s15  ;;  %s1000_s16 = sshll.u32 %s1084_s28, 4  ;;  %s1001_s16 = int_to_ptr.vmem [resolvable:$false] %s1000_s16 }
  0x4b   : > { %s1002_s17 = scalar_lea.vmem %s1001_s16, 512  ;;  %p1003_p4 = scmp.lt.s32.totalorder %s1232_s25, %s1001_s16 }
  0x4c   : > { %p998_p9 = pnand %p997_p7, %p726_p5  ;;  %p1004_p6 = scmp.lt.s32.totalorder %s1002_s17, %s996_s15 }
  0x4e   : > { %p999_p12 = pneg %p998_p9  ;;  %p1005_p11 = por %p1004_p6, %p1003_p4 }
  0x50   : > { %p1006_p0 = pnand %p1005_p11, %p999_p12 }
  0x52   : > { %1009 = shalt.err (!%p1006_p0)
}
  0x53   : > { %s1085_s26 = smov 128   ;;  %s1086_s8 = smov 8  }
  0x54   : > { %233 = dma.hbm_to_vmem [thread:$0]  (%p726_p5), %s1230_s23, %s1219_s10, %s1232_s25, %s1222_s14, %s1085_s26, %s1085_s26, %s1086_s8  }
  0x55 PF: > { %239 = sbr.rel (%p1182_p13) target bundleno = 563 (0x233), region = 40  ;;  %s1261_s9 = sand.u32 (!%p1182_p13), 1, %s1070_s19  }
  0x56   : > { %s732_s11 = sshll.u32 (!%p1182_p13), %s1261_s9, 4  ;;  %s242_s13 = scalar_lea.sflag (!%p1182_p13), [#allocation3], %s1261_s9 }
  0x57   : > { %s1265_s12 = scalar_lea.vmem (!%p1182_p13), [#allocation2], %s732_s11  ;;  %p1359_p2 = scmp.ne.s32.totalorder (!%p1182_p13), %s1354_s29, 0 }
  0x5a   : > { %1053 = dma.done.wait (%p1359_p2), %s242_s13, 256  }
  0x5b   : > { %1055 = vsyncadd (%p1359_p2), %s242_s13, 4294967040  ;;  %p1360_p5 = scmp.eq.s32.totalorder %s1143_s22, 0 }
  0x5d   : > { %1057 = dma.done.wait (%p1360_p5), [#allocation6], 3072   ;;  %p1361_p13 = pmov %p1360_p5 }
  0x5e   : > { %v1087_v0 = vmov 0.0   ;;  %v905_v1 = vld [vmem:[#allocation5 + $0x78] sm:$0xff]   ;;  %v907_v3 = vld [vmem:[#allocation5 + $0x70] sm:$0xff]   ;;  %v909_v5 = vld [vmem:[#allocation5 + $0x68] sm:$0xff]   ;;  %vm1088_vm0 = vmmov 0   ;;  %s735_s23 = sshll.u32 %s1261_s9, 3 }
  0x5f   : > { %1059 = vsyncadd (%p1361_p13), [#allocation6], 4294964224  ;;  %817 = vmatprep.subr.bf16.mxu1 %v1087_v0  ;;  %v906_v2 = vld [vmem:[#allocation5 + $0x38] sm:$0xff]   ;;  %786 = vmatprep.subr.bf16.mxu0 %v905_v1  ;;  %v908_v4 = vld [vmem:[#allocation5 + $0x30] sm:$0xff]   ;;  %s279_s25 = scalar_lea.vmem [#allocation8], %s735_s23  ;;  %s606_s15 = scalar_lea.sflag [#allocation4], %s1261_s9 }
  0x60   : > { %787 = vmatpush3.bf16.msra.mxu0 %v906_v2  ;;  %v910_v6 = vld [vmem:[#allocation5 + $0x28] sm:$0xff]   ;;  %v911_v7 = vld [vmem:[#allocation5 + $0x60] sm:$0xff]   ;;  %v913_v9 = vld [vmem:[#allocation5 + $0x58] sm:$0xff]   ;;  %833 = vmatprep.mubr.msk.bf16.mxu1 %vm1088_vm0, %v1087_v0  ;;  %p1362_p10 = scmp.ne.s32.totalorder %s1355_s30, 0 }
  0x61   : > { %788 = vmatprep.subr.bf16.mxu0 %v907_v3  ;;  %v912_v8 = vld [vmem:[#allocation5 + $0x20] sm:$0xff]   ;;  %v914_v10 = vld [vmem:[#allocation5 + $0x18] sm:$0xff]   ;;  %v915_v11 = vld [vmem:[#allocation5 + $0x50] sm:$0xff]   ;;  %s767_s28 = sshll.u32 (%p1362_p10), %s1143_s22, 1 }
  0x62   : > { %v916_v12 = vld [vmem:[#allocation5 + $0x10] sm:$0xff]   ;;  %v924_v14 = vld [vmem:[#allocation7 + $0x38] sm:$0xff]   ;;  %v917_v15 = vld [vmem:[#allocation5 + $0x48] sm:$0xff]   ;;  %s614_s16 = ssub.s32 (%p1362_p10), 3, %s767_s28 }
  0x63   : > { %v923_v13 = vld [vmem:[%s1265_s12 + $0x4] ss:$8 sps:$4 sm:$0xff]   ;;  %818 = vmatpush3.bf16.msra.mxu1 %v924_v14  ;;  %v921_v22 = vld [vmem:[%s1265_s12] ss:$8 sps:$4 sm:$0xff]   ;;  %p615_p1 = scmp.lt.s32.totalorder (%p1362_p10), %s614_s16, 2 }
  0x64   : > { %789 = vmatpush3.bf16.msra.mxu0 %v908_v4  ;;  %471 = vmatprep.mubr.bf16.mxu0 %v923_v13  ;;  %v925_v16 = vld [vmem:[#allocation7 + $0x30] sm:$0xff]   ;;  %v918_v17 = vld [vmem:[#allocation5 + $0x8] sm:$0xff]   ;;  %v919_v18 = vld [vmem:[#allocation5 + $0x40] sm:$0xff]  }
  0x65   : > { %790 = vmatprep.subr.bf16.mxu0 %v909_v5  ;;  %819 = vmatprep.subr.bf16.mxu1 %v1087_v0  ;;  %v926_v19 = vld [vmem:[#allocation7 + $0x28] sm:$0xff]   ;;  %v920_v20 = vld [vmem:[#allocation5] sm:$0xff]   ;;  %v928_v23 = vld [vmem:[#allocation7 + $0x18] sm:$0xff]  }
  0x66   : > { %v927_v21 = vld [vmem:[#allocation7 + $0x20] sm:$0xff]   ;;  %v929_v24 = vld [vmem:[#allocation7 + $0x10] sm:$0xff]   ;;  %v930_v25 = vld [vmem:[#allocation7 + $0x8] sm:$0xff]  }
  0x67   : > { %820 = vmatpush3.bf16.msra.mxu1 %v925_v16  ;;  %v931_v26 = vld [vmem:[#allocation7] sm:$0xff]  }
  0x68   : > { %791 = vmatpush3.bf16.msra.mxu0 %v910_v6  ;;  %821 = vmatprep.subr.bf16.mxu1 %v1087_v0  ;;  %v736_v30 = vld [vmem:[%s1347_s2] ss:$0 sm:$0xff] }
  0x69   : > { %792 = vmatprep.subr.bf16.mxu0 %v911_v7  ;;  %v755_v40 = vld [vmem:[%s1349_s4] ss:$0 sm:$0xff] }
  0x6b   : > { %822 = vmatpush3.bf16.msra.mxu1 %v926_v19 }
  0x6c   : > { %793 = vmatpush3.bf16.msra.mxu0 %v912_v8  ;;  %823 = vmatprep.subr.bf16.mxu1 %v1087_v0 }
  0x6d   : > { %794 = vmatprep.subr.bf16.mxu0 %v913_v9 }
  0x6f   : > { %824 = vmatpush3.bf16.msra.mxu1 %v927_v21 }
  0x70   : > { %795 = vmatpush3.bf16.msra.mxu0 %v914_v10  ;;  %825 = vmatprep.subr.bf16.mxu1 %v1087_v0 }
  0x71   : > { %796 = vmatprep.subr.bf16.mxu0 %v915_v11 }
  0x73   : > { %826 = vmatpush3.bf16.msra.mxu1 %v928_v23 }
  0x74   : > { %797 = vmatpush3.bf16.msra.mxu0 %v916_v12  ;;  %827 = vmatprep.subr.bf16.mxu1 %v1087_v0 }
  0x75   : > { %798 = vmatprep.subr.bf16.mxu0 %v917_v15 }
  0x77   : > { %828 = vmatpush3.bf16.msra.mxu1 %v929_v24 }
  0x78   : > { %799 = vmatpush3.bf16.msra.mxu0 %v918_v17  ;;  %829 = vmatprep.subr.bf16.mxu1 %v1087_v0 }
  0x79   : > { %800 = vmatprep.subr.bf16.mxu0 %v919_v18 }
  0x7b   : > { %830 = vmatpush3.bf16.msra.mxu1 %v930_v25 }
  0x7c   : > { %801 = vmatpush3.bf16.msra.mxu0 %v920_v20  ;;  %831 = vmatprep.subr.bf16.mxu1 %v1087_v0 }
  0x7f   : > { %472 = vmatmul.mubr.bf16.vlgmr.msra.gmra.mxu0 %v921_v22  ;;  %832 = vmatpush3.bf16.msra.mxu1 %v931_v26 }
 0x13f   : > { %v802_v27 = vpop.f32.mrf.mxu0 }
 0x141   : > { %v803_v28 = vpop.f32.mrf.mxu0 }
 0x142   : > { %v804_v29 = vadd.f32 %v803_v28, %v802_v27 }
 0x143   : > { %v805_v31 = vpop.f32.mrf.mxu0 }
 0x144   : > { %v474_v33 = vadd.f32 %v804_v29, %v736_v30 }
 0x145   : > { %v806_v32 = vpop.f32.mrf.mxu0 }
 0x146   : > { %v807_v34 = vadd.f32 %v806_v32, %v805_v31  ;;  %v480_v36 = vmax.f32 %v474_v33, 0.0 }
 0x148   : > { %v477_v35 = vadd.f32 %v807_v34, %v736_v30 }
 0x14a   : > { %v481_v37 = vmax.f32 %v477_v35, 0.0 }
 0x14c   : > { %v482_v38 = vpack.c.bf16 %v481_v37, %v480_v36 }
 0x14e   : > { %834 = vmatmul.mubr.bf16.vlgmr.msra.gmra.mxu1 %v482_v38 }
 0x20e   : > { %v588_v39 = vpop.f32.mrf.mxu1 }
 0x20f   : > { %v589_v43 = vadd.f32 %v755_v40, %v588_v39 }
 0x210   : > { %v835_v41 = vpop.f32.mrf.mxu1 }
 0x212   : > { %v591_v42 = vpop.f32.mrf.mxu1 }
 0x213   : > { %v592_v44 = vadd.f32 %v755_v40, %v591_v42  ;;  %612 = sbr.rel (!%p1362_p10) target bundleno = 563 (0x233), region = 56 }
 0x214   : > { %v836_v45 = vpop.f32.mrf.mxu1 }
 0x215   : > { %v784_v46 = vpack.c.bf16 %v592_v44, %v589_v43 }
 0x217   : > { %785 = vst [vmem:[%s279_s25] sm:$0xff] %v784_v46  }
 0x218   : > { %s1371_s16 = smov (!%p615_p1, %s614_s16), 2 }
 0x219   : > { %s1288_s17 = sshll.u32 %s1371_s16, 6 }
 0x21a   : > { %s619_s26 = ssub.s32 128, %s1288_s17 }
 0x21b   : > { %620 = vsyncadd %s606_s15, %s619_s26  ;;  %p769_p3 = scmp.ne.s32.totalorder %s1288_s17, 0  ;;  %s780_s8 = sshll.u32 %s1143_s22, 7 }
 0x21c   : > { %s1298_s13 = scalar_lea.hbm %s1350_s5, %s780_s8  ;;  %s625_s12 = sshll.u32 %s279_s25, 4  ;;  %s1300_s12 = int_to_ptr.vmem [resolvable:$true] %s625_s12 }
 0x21d   : > { %s1010_s29 = scalar_lea.vmem %s1300_s12, %s1288_s17  ;;  %s1089_s7 = smov [#allocation8]  }
 0x21e   : > { %p1011_p7 = scmp.ne.s32.totalorder %s1300_s12, %s1010_s29  ;;  %s1014_s10 = sshll.u32 %s1089_s7, 4  ;;  %s1015_s10 = int_to_ptr.vmem [resolvable:$false] %s1014_s10 }
 0x21f   : > { %s1016_s22 = scalar_lea.vmem %s1015_s10, 256  ;;  %p1017_p4 = scmp.lt.s32.totalorder %s1300_s12, %s1015_s10 }
 0x220   : > { %p1012_p9 = pnand %p1011_p7, %p769_p3  ;;  %p1018_p6 = scmp.lt.s32.totalorder %s1016_s22, %s1010_s29 }
 0x222   : > { %p1013_p12 = pneg %p1012_p9  ;;  %p1019_p11 = por %p1018_p6, %p1017_p4 }
 0x224   : > { %p1020_p0 = pnand %p1019_p11, %p1013_p12 }
 0x226   : > { %1023 = shalt.err (!%p1020_p0)
}
 0x227   : > { %s1024_s14 = scalar_lea.hbm %s1298_s13, %s1288_s17  ;;  %s1028_s28 = scalar_lea.hbm %s1350_s5, 192 }
 0x228   : > { %p1025_p2 = scmp.ne.s32.totalorder %s1298_s13, %s1024_s14  ;;  %p1029_p10 = scmp.lt.s32.totalorder %s1298_s13, %s1350_s5 }
 0x229   : > { %p1030_p1 = scmp.lt.s32.totalorder %s1028_s28, %s1024_s14 }
 0x22a   : > { %p1026_p5 = pnand %p1025_p2, %p769_p3 }
 0x22b   : > { %p1031_p7 = por %p1030_p1, %p1029_p10 }
 0x22c   : > { %p1027_p13 = pneg %p1026_p5 }
 0x22e   : > { %p1032_p9 = pnand %p1031_p7, %p1027_p13 }
 0x230   : > { %1035 = shalt.err (!%p1032_p9)
}
 0x231   : > { %s1090_s8 = smov 64   ;;  %s1091_s30 = smov 4  }
 0x232   : > { %631 = dma.vmem_to_hbm [thread:$0]  (%p769_p3), %s1300_s12, %s1288_s17, %s1298_s13, %s606_s15, %s1090_s8, %s1090_s8, %s1091_s30  }
 0x233 PF: > { %s640_s11 = sand.u32 1, %s1066_s18   ;;  %p1363_p12 = scmp.ne.s32.totalorder %s1356_s6, 0 }
 0x234   : > { %s641_s29 = scalar_lea.sflag [#allocation4], %s640_s11 }
 0x235   : > { %p855_p4 = pnand %p721_p8, %p1363_p12 }
 0x237   : > { %p856_p6 = pneg %p855_p4 }
 0x239   : > { %1061 = dma.done.wait (%p856_p6), %s641_s29, 128  }
 0x23a   : > { %1063 = vsyncadd (%p856_p6), %s641_s29, 4294967168  ;;  %p19_p11 = scmp.ge.s32.totalorder %s1147_s24, 4   ;;  %s1364_s18 = smov %s1070_s19 }
 0x23b   : > { %s1365_s19 = smov %s1074_s20  ;;  %s1366_s20 = smov %s1159_s27 }
 0x23c   : > { %s1367_s21 = smov %s1147_s24  ;;  %21 = sbr.rel (!%p19_p11) target bundleno = 6 (0x6), region = 93 }
 0x241   :  { %646 = vsyncpa [#allocation3], 1 }
 0x242   :  { %648 = vsyncpa [#allocation3 + $0x1], 1 }
 0x243   :  { %649 = vsyncpa [#allocation6], 1 }
 0x244   :  { %650 = vsyncpa [#allocation4], 1 }
 0x245   :  { %652 = vsyncpa [#allocation4 + $0x1], 1 }

</bundles_post_ra>
